<compile_context>
chip_gen: v7x
topology: tpu7x:2x2x1
jax: 0.10.0
libtpu: 0.0.40
codegen_flags: <defaults>
</compile_context>

<pallas_src>
import math
import numpy as np
import jax
import jax.numpy as jnp
from jax import lax
from jax.experimental import pallas as pl
from jax.experimental.pallas import tpu as pltpu

WINDOW_SIZE = 11
SIGMA = 1.5


# ----------------------------------------------------------------------------
# Host-side window / band-matrix construction
# ----------------------------------------------------------------------------
def gaussian_1d(window_size: int, sigma: float) -> np.ndarray:
    g = np.array(
        [math.exp(-(x - window_size // 2) ** 2 / float(2 * sigma ** 2))
         for x in range(window_size)],
        dtype=np.float64,
    )
    return (g / g.sum()).astype(np.float32)


def conv_band_matrix(n: int, g: np.ndarray) -> np.ndarray:
    """K such that (K @ x) == 1-D 'same' zero-padded cross-correlation of the
    columns of x with g.  K[i, j] = g[j - i + pad] for |j - i| <= pad."""
    ws = g.shape[0]
    pad = ws // 2
    K = np.zeros((n, n), dtype=np.float32)
    for i in range(n):
        for j in range(max(0, i - pad), min(n, i + pad + 1)):
            K[i, j] = g[j - i + pad]
    return K


def build_vertical_strips(H, TH, TH_halo, starts, g):
    """Per-strip transposed vertical band blocks: KvT_strips[s][j, i] equals the
    weight of loaded row (starts[s] + j) for output row (s*TH + i)."""
    Kfull = conv_band_matrix(H, g)                 # (H, H)
    S = H // TH
    strips = np.zeros((S, TH_halo, TH), dtype=np.float32)
    for s in range(S):
        rs = int(starts[s])
        strips[s] = Kfull[s * TH:(s + 1) * TH, rs:rs + TH_halo].T
    return strips


# ----------------------------------------------------------------------------
# VMEM budgeting (generation-aware) and strip-size selection
# ----------------------------------------------------------------------------
def _vmem_budget_bytes():
    cap = 64 * 2 ** 20                      # conservative default (v7x per-TC)
    try:
        info = pltpu.get_tpu_info()
        cap = int(getattr(info, "vmem_capacity_bytes", cap))
    except Exception:
        pass
    # ~48 MiB on v7x, ~96 MiB on v5e/v6e.
    return max(int(0.75 * cap), 32 * 2 ** 20)


def _f32_tile_bytes(rows, cols):
    # crude vreg-padded f32 size estimate
    return 4 * (-(-int(rows) // 8) * 8) * (-(-int(cols) // 128) * 128)


def _working_set_bytes(C, H, W, TH, halo):
    TH_halo = min(TH + 2 * halo, H)
    P = 5 * C
    imgs = 2 * 2 * _f32_tile_bytes(C * H, W)            # img1/img2, double-buffered
    kmats = 2 * (_f32_tile_bytes(TH_halo, TH) + _f32_tile_bytes(W, W))
    outb = 2 * _f32_tile_bytes(TH, C * W)
    xy = 2 * _f32_tile_bytes(C * TH_halo, W)            # loaded strips
    slabs = 2 * _f32_tile_bytes(P * TH_halo, W)         # Z, Th
    slabs += _f32_tile_bytes(P * W, TH_halo)            # transposed Th
    slabs += _f32_tile_bytes(P * W, TH)                 # blurred stats B
    elem = 8 * _f32_tile_bytes(C * W, TH)               # elementwise temps
    return int(1.25 * (imgs + kmats + outb + xy + slabs + elem))


def _choose_block_rows(C, H, W, halo, budget):
    cands = []
    if H <= 256:
        cands.append(H)                                  # whole-plane for moderate H
    for t in (256, 128, 64, 32, 16, 8):                  # prefer 128/256-aligned strips
        if t < H and H % t == 0:
            cands.append(t)
    if H not in cands:
        cands.append(H)                                  # last resort: whole plane
    for th in cands:
        if _working_set_bytes(C, H, W, th, halo) <= budget:
            return th
    return min(cands, key=lambda th: _working_set_bytes(C, H, W, th, halo))


# ----------------------------------------------------------------------------
# Kernel
# ----------------------------------------------------------------------------
def ssim_kernel(c_ref, starts_ref, kvt_ref, kht_ref, img1_ref, img2_ref, out_ref):
    C1 = c_ref[0]
    C2 = c_ref[1]

    s = pl.program_id(1)
    rs = starts_ref[s]                      # first loaded row of this strip (clamped)

    KvT = kvt_ref[0]                        # (TH_halo, TH)
    KhT = kht_ref[...]                      # (W, W)

    _, C, H, W = img1_ref.shape
    TH_halo = kvt_ref.shape[1]
    TH = kvt_ref.shape[2]
    P = 5 * C
    CW = C * W

    if H % 8 == 0 and TH % 8 == 0:          # starts are 8-aligned by construction
        rs = pl.multiple_of(rs, 8)

    # Load only the halo'd strip (not the whole plane) from the resident block.
    x = img1_ref[0, :, pl.ds(rs, TH_halo), :].astype(jnp.float32)   # (C, THh, W)
    y = img2_ref[0, :, pl.ds(rs, TH_halo), :].astype(jnp.float32)   # (C, THh, W)

    # ---- stack [x, y, x*x, y*y, x*y] for all channels along sublanes.
    Z = jnp.concatenate([x, y, x * x, y * y, x * y], axis=0)        # (5C, THh, W)
    Z2 = Z.reshape(P * TH_halo, W)

    # ---- horizontal blur: ONE (5C*THh, W) x (W, W) matmul for all planes.
    Th = jnp.dot(Z2, KhT, preferred_element_type=jnp.float32)       # (5C*THh, W)

    # ---- single relayout between passes: batched minor-dims transpose.
    Tht = jnp.transpose(Th.reshape(P, TH_halo, W), (0, 2, 1))       # (5C, W, THh)
    Tht2 = Tht.reshape(P * W, TH_halo)

    # ---- vertical blur: ONE (5C*W, THh) x (THh, TH) banded matmul.
    B = jnp.dot(Tht2, KvT, preferred_element_type=jnp.float32)      # (5C*W, TH)

    mu1 = B[0 * CW:1 * CW]
    mu2 = B[1 * CW:2 * CW]
    bxx = B[2 * CW:3 * CW]
    byy = B[3 * CW:4 * CW]
    bxy = B[4 * CW:5 * CW]

    mu1_sq = mu1 * mu1
    mu2_sq = mu2 * mu2
    mu1_mu2 = mu1 * mu2
    sigma1_sq = jnp.maximum(bxx - mu1_sq, 0.0)    # F.relu
    sigma2_sq = jnp.maximum(byy - mu2_sq, 0.0)    # F.relu
    sigma12 = bxy - mu1_mu2

    num = (2.0 * mu1_mu2 + C1) * (2.0 * sigma12 + C2)
    den = (mu1_sq + mu2_sq + C1) * (sigma1_sq + sigma2_sq + C2)
    ssim_map = num / den                           # exact division (tolerance)

    # reduction is None -> the module returns 1.0 - ssim_map.
    # Store as one (TH, C*W) block: lane-dense whenever C*W >= 128.
    out_ref[0] = (1.0 - ssim_map).T.astype(out_ref.dtype)


# ----------------------------------------------------------------------------
# Wrapper
# ----------------------------------------------------------------------------
def ssim_pallas(img1, img2, window_size=WINDOW_SIZE, sigma=SIGMA,
                block_rows=None, data_range=None):
    N, C, H, W = img1.shape
    pad = window_size // 2
    halo = ((pad + 7) // 8) * 8            # aligned halo (>= pad, multiple of 8)
    g = gaussian_1d(window_size, sigma)

    budget = _vmem_budget_bytes()
    if block_rows is None:
        TH = _choose_block_rows(C, H, W, halo, budget)
    else:
        TH = int(min(block_rows, H))
        assert H % TH == 0, "block_rows must divide H"
    TH_halo = min(TH + 2 * halo, H)
    S = H // TH

    # Per-strip clamped start rows (also used to build the vertical bands).
    starts_np = np.array(
        [min(max(s * TH - halo, 0), H - TH_halo) for s in range(S)],
        dtype=np.int32)
    KvT_strips = jnp.asarray(build_vertical_strips(H, TH, TH_halo, starts_np, g))
    KhT = jnp.asarray(conv_band_matrix(W, g).T)
    starts = jnp.asarray(starts_np)

    # Data-dependent C1/C2 (matches the PyTorch branch).  Pass data_range to
    # skip this extra HBM pass when the dynamic range is statically known.
    if data_range is None:
        max_val = jnp.where(jnp.max(img1) > 128.0, 255.0, 1.0)
        min_val = jnp.where(jnp.min(img1) < -0.5, -1.0, 0.0)
        L = max_val - min_val
    else:
        L = jnp.float32(data_range)
    c = jnp.stack([(0.01 * L) ** 2, (0.03 * L) ** 2]).astype(jnp.float32)

    est = _working_set_bytes(C, H, W, TH, halo)
    vmem_limit = int(min(max(est, 32 * 2 ** 20), budget))

    out_hwc = pl.pallas_call(
        ssim_kernel,
        # force float32 output regardless of input dtype
        out_shape=jax.ShapeDtypeStruct((N, H, C * W), jnp.float32),
        grid=(N, S),
        in_specs=[
            pl.BlockSpec(memory_space=pltpu.MemorySpace.SMEM),        # C1, C2
            pl.BlockSpec(memory_space=pltpu.MemorySpace.SMEM),        # strip starts
            pl.BlockSpec((1, TH_halo, TH), lambda n, s: (s, 0, 0)),   # KvT strips
            pl.BlockSpec((W, W), lambda n, s: (0, 0)),                # Kh^T
            pl.BlockSpec((1, C, H, W), lambda n, s: (n, 0, 0, 0)),    # img1 plane
            pl.BlockSpec((1, C, H, W), lambda n, s: (n, 0, 0, 0)),    # img2 plane
        ],
        out_specs=pl.BlockSpec((1, TH, C * W), lambda n, s: (n, s, 0)),
        compiler_params=pltpu.CompilerParams(
            dimension_semantics=("parallel", "parallel"),
            vmem_limit_bytes=vmem_limit),
    )(c, starts, KvT_strips, KhT, img1, img2)

    # Layout plumbing only: (N, H, C*W) -> (N, C, H, W).
    return out_hwc.reshape(N, H, C, W).transpose(0, 2, 1, 3)


# ----------------------------------------------------------------------------
# Pure-JAX reference (mirrors the PyTorch module exactly)
# ----------------------------------------------------------------------------
def ssim_ref(img1, img2, window_size=WINDOW_SIZE, sigma=SIGMA):
    N, C, H, W = img1.shape
    g = gaussian_1d(window_size, sigma)
    w2d = np.outer(g, g).astype(np.float32)
    window = jnp.asarray(np.tile(w2d[None, None], (C, 1, 1, 1)))
    pad = window_size // 2

    def conv(x):
        return lax.conv_general_dilated(
            x, window, window_strides=(1, 1),
            padding=[(pad, pad), (pad, pad)],
            dimension_numbers=("NCHW", "OIHW", "NCHW"),
            feature_group_count=C)

    max_val = jnp.where(jnp.max(img1) > 128.0, 255.0, 1.0)
    min_val = jnp.where(jnp.min(img1) < -0.5, -1.0, 0.0)
    L = max_val - min_val
    C1 = (0.01 * L) ** 2
    C2 = (0.03 * L) ** 2

    mu1 = conv(img1)
    mu2 = conv(img2)
    mu1_sq = mu1 * mu1
    mu2_sq = mu2 * mu2
    mu1_mu2 = mu1 * mu2
    s1 = jnp.maximum(conv(img1 * img1) - mu1_sq, 0.0)
    s2 = jnp.maximum(conv(img2 * img2) - mu2_sq, 0.0)
    s12 = conv(img1 * img2) - mu1_mu2
    ssim_map = ((2 * mu1_mu2 + C1) * (2 * s12 + C2) /
                ((mu1_sq + mu2_sq + C1) * (s1 + s2 + C2)))
    return 1.0 - ssim_map


if __name__ == "__main__":
    key = jax.random.PRNGKey(0)
    k1, k2, k3, k4 = jax.random.split(key, 4)

    # Case 1: small shapes, whole-plane path (TH == H).
    N, C, H, W = 2, 4, 16, 16
    a1 = jax.random.uniform(k1, (N, C, H, W), dtype=jnp.float32)
    a2 = jax.random.uniform(k2, (N, C, H, W), dtype=jnp.float32)
    out1 = jax.block_until_ready(ssim_pallas(a1, a2))
    ref1 = jax.block_until_ready(ssim_ref(a1, a2))
    assert out1.shape == (N, C, H, W) and out1.dtype == jnp.float32
    if not np.allclose(np.asarray(out1), np.asarray(ref1), atol=1e-4, rtol=1e-4):
        raise AssertionError("Pallas SSIM (whole-plane path) does not match reference")

    # Case 2: force the strip-tiled path (halo + edge clamping exercised).
    N2, C2, H2, W2 = 1, 3, 64, 128
    b1 = jax.random.uniform(k3, (N2, C2, H2, W2), dtype=jnp.float32)
    b2 = jax.random.uniform(k4, (N2, C2, H2, W2), dtype=jnp.float32)
    out2 = jax.block_until_ready(ssim_pallas(b1, b2, block_rows=16))
    ref2 = jax.block_until_ready(ssim_ref(b1, b2))
    if not np.allclose(np.asarray(out2), np.asarray(ref2), atol=1e-4, rtol=1e-4):
        raise AssertionError("Pallas SSIM (strip-tiled path) does not match reference")

    print("KERNEL_OK")
</pallas_src>

<mosaic_0001>
module attributes {stable_mosaic.version = 11 : i64} {
  func.func @ssim_kernel(%arg0: i32, %arg1: i32, %arg2: memref<2xf32, #tpu.memory_space<smem>>, %arg3: memref<1xi32, #tpu.memory_space<smem>>, %arg4: memref<1x16x16xf32, #tpu.memory_space<vmem>>, %arg5: memref<16x16xf32, #tpu.memory_space<vmem>>, %arg6: memref<1x4x16x16xf32, #tpu.memory_space<vmem>>, %arg7: memref<1x4x16x16xf32, #tpu.memory_space<vmem>>, %arg8: memref<1x16x64xf32, #tpu.memory_space<vmem>>) attributes {dimension_semantics = [#tpu.dimension_semantics<parallel>, #tpu.dimension_semantics<parallel>], iteration_bounds = array<i64: 2, 1>, scalar_prefetch = 0 : i64, scratch_operands = 0 : i64, tpu.core_type = #tpu.core_type<tc>, window_params = [{transform_indices = @transform_0, window_bounds = array<i64: 2>}, {transform_indices = @transform_1, window_bounds = array<i64: 1>}, {transform_indices = @transform_2, window_bounds = array<i64: 1, 16, 16>}, {pipeline_mode = #tpu.pipeline_mode<synchronous>, transform_indices = @transform_3, window_bounds = array<i64: 16, 16>}, {transform_indices = @transform_4, window_bounds = array<i64: 1, 4, 16, 16>}, {transform_indices = @transform_5, window_bounds = array<i64: 1, 4, 16, 16>}, {transform_indices = @transform_6, window_bounds = array<i64: 1, 16, 64>}]} {
    %c0 = arith.constant 0 : index
    %0 = memref.load %arg2[%c0] : memref<2xf32, #tpu.memory_space<smem>>
    %c1 = arith.constant 1 : index
    %1 = memref.load %arg2[%c1] : memref<2xf32, #tpu.memory_space<smem>>
    %2 = arith.index_cast %arg1 : i32 to index
    %3 = memref.load %arg3[%2] : memref<1xi32, #tpu.memory_space<smem>>
    %c0_0 = arith.constant 0 : index
    %c0_1 = arith.constant 0 : index
    %c0_2 = arith.constant 0 : index
    %4 = vector.load %arg4[%c0_0, %c0_1, %c0_2] : memref<1x16x16xf32, #tpu.memory_space<vmem>>, vector<1x16x16xf32>
    %5 = vector.shape_cast %4 : vector<1x16x16xf32> to vector<16x16xf32>
    %c0_3 = arith.constant 0 : index
    %c0_4 = arith.constant 0 : index
    %6 = vector.load %arg5[%c0_3, %c0_4] : memref<16x16xf32, #tpu.memory_space<vmem>>, vector<16x16xf32>
    %7 = tpu.assume_multiple %3, 8 : i32
    %c0_5 = arith.constant 0 : index
    %c0_6 = arith.constant 0 : index
    %8 = arith.index_cast %7 : i32 to index
    %c0_7 = arith.constant 0 : index
    %9 = vector.load %arg6[%c0_5, %c0_6, %8, %c0_7] : memref<1x4x16x16xf32, #tpu.memory_space<vmem>>, vector<1x4x16x16xf32>
    %10 = vector.shape_cast %9 : vector<1x4x16x16xf32> to vector<4x16x16xf32>
    %c0_8 = arith.constant 0 : index
    %c0_9 = arith.constant 0 : index
    %11 = arith.index_cast %7 : i32 to index
    %c0_10 = arith.constant 0 : index
    %12 = vector.load %arg7[%c0_8, %c0_9, %11, %c0_10] : memref<1x4x16x16xf32, #tpu.memory_space<vmem>>, vector<1x4x16x16xf32>
    %13 = vector.shape_cast %12 : vector<1x4x16x16xf32> to vector<4x16x16xf32>
    %14 = arith.mulf %10, %10 : vector<4x16x16xf32>
    %15 = arith.mulf %13, %13 : vector<4x16x16xf32>
    %16 = arith.mulf %10, %13 : vector<4x16x16xf32>
    %17 = tpu.concatenate %10, %13, %14, %15, %16 in 0 : vector<4x16x16xf32>, vector<4x16x16xf32>, vector<4x16x16xf32>, vector<4x16x16xf32>, vector<4x16x16xf32> -> vector<20x16x16xf32>
    %18 = vector.shape_cast %17 : vector<20x16x16xf32> to vector<320x16xf32>
    %cst = arith.constant dense<0.000000e+00> : vector<320x16xf32>
    %19 = tpu.matmul %18, %6, %cst {dimension_numbers = #tpu.dot_dimension_numbers<[1], [0], [0], [1], [0, 0, 1, 1], [], []>} : vector<320x16xf32>, vector<16x16xf32>, vector<320x16xf32> -> vector<320x16xf32>
    %20 = vector.shape_cast %19 : vector<320x16xf32> to vector<20x16x16xf32>
    %21 = tpu.transpose %20, [0, 2, 1] : vector<20x16x16xf32> -> vector<20x16x16xf32>
    %22 = vector.shape_cast %21 : vector<20x16x16xf32> to vector<320x16xf32>
    %cst_11 = arith.constant dense<0.000000e+00> : vector<320x16xf32>
    %23 = tpu.matmul %22, %5, %cst_11 {dimension_numbers = #tpu.dot_dimension_numbers<[1], [0], [0], [1], [0, 0, 1, 1], [], []>} : vector<320x16xf32>, vector<16x16xf32>, vector<320x16xf32> -> vector<320x16xf32>
    %24 = vector.extract_strided_slice %23 {offsets = [0, 0], sizes = [64, 16], strides = [1, 1]} : vector<320x16xf32> to vector<64x16xf32>
    %25 = vector.extract_strided_slice %23 {offsets = [64, 0], sizes = [64, 16], strides = [1, 1]} : vector<320x16xf32> to vector<64x16xf32>
    %26 = vector.extract_strided_slice %23 {offsets = [128, 0], sizes = [64, 16], strides = [1, 1]} : vector<320x16xf32> to vector<64x16xf32>
    %27 = vector.extract_strided_slice %23 {offsets = [192, 0], sizes = [64, 16], strides = [1, 1]} : vector<320x16xf32> to vector<64x16xf32>
    %28 = vector.extract_strided_slice %23 {offsets = [256, 0], sizes = [64, 16], strides = [1, 1]} : vector<320x16xf32> to vector<64x16xf32>
    %29 = arith.mulf %24, %24 : vector<64x16xf32>
    %30 = arith.mulf %25, %25 : vector<64x16xf32>
    %31 = arith.mulf %24, %25 : vector<64x16xf32>
    %32 = arith.subf %26, %29 : vector<64x16xf32>
    %cst_12 = arith.constant 0.000000e+00 : f32
    %33 = vector.broadcast %cst_12 : f32 to vector<64x16xf32>
    %34 = arith.maximumf %32, %33 : vector<64x16xf32>
    %35 = arith.subf %27, %30 : vector<64x16xf32>
    %cst_13 = arith.constant 0.000000e+00 : f32
    %36 = vector.broadcast %cst_13 : f32 to vector<64x16xf32>
    %37 = arith.maximumf %35, %36 : vector<64x16xf32>
    %38 = arith.subf %28, %31 : vector<64x16xf32>
    %cst_14 = arith.constant 2.000000e+00 : f32
    %39 = vector.broadcast %cst_14 : f32 to vector<64x16xf32>
    %40 = arith.mulf %39, %31 : vector<64x16xf32>
    %41 = vector.broadcast %0 : f32 to vector<64x16xf32>
    %42 = arith.addf %40, %41 : vector<64x16xf32>
    %cst_15 = arith.constant 2.000000e+00 : f32
    %43 = vector.broadcast %cst_15 : f32 to vector<64x16xf32>
    %44 = arith.mulf %43, %38 : vector<64x16xf32>
    %45 = vector.broadcast %1 : f32 to vector<64x16xf32>
    %46 = arith.addf %44, %45 : vector<64x16xf32>
    %47 = arith.mulf %42, %46 : vector<64x16xf32>
    %48 = arith.addf %29, %30 : vector<64x16xf32>
    %49 = vector.broadcast %0 : f32 to vector<64x16xf32>
    %50 = arith.addf %48, %49 : vector<64x16xf32>
    %51 = arith.addf %34, %37 : vector<64x16xf32>
    %52 = vector.broadcast %1 : f32 to vector<64x16xf32>
    %53 = arith.addf %51, %52 : vector<64x16xf32>
    %54 = arith.mulf %50, %53 : vector<64x16xf32>
    %55 = arith.divf %47, %54 : vector<64x16xf32>
    %cst_16 = arith.constant 1.000000e+00 : f32
    %56 = vector.broadcast %cst_16 : f32 to vector<64x16xf32>
    %57 = arith.subf %56, %55 : vector<64x16xf32>
    %58 = tpu.transpose %57, [1, 0] : vector<64x16xf32> -> vector<16x64xf32>
    %c0_17 = arith.constant 0 : index
    %c0_18 = arith.constant 0 : index
    %c0_19 = arith.constant 0 : index
    %59 = vector.load %arg8[%c0_17, %c0_18, %c0_19] : memref<1x16x64xf32, #tpu.memory_space<vmem>>, vector<1x16x64xf32>
    %60 = vector.shape_cast %59 : vector<1x16x64xf32> to vector<16x64xf32>
    %61 = vector.shape_cast %58 : vector<16x64xf32> to vector<1x16x64xf32>
    tpu.vector_store %arg8[%c0_17, %c0_18, %c0_19], %61 {strides = array<i32>} : memref<1x16x64xf32, #tpu.memory_space<vmem>>, vector<1x16x64xf32>,
    return
  }
  func.func @transform_0(%arg0: i32, %arg1: i32) -> i32 {
    %c0_i32 = arith.constant 0 : i32
    %c0_i32_0 = arith.constant 0 : i32
    return %c0_i32 : i32
  }
  func.func @transform_1(%arg0: i32, %arg1: i32) -> i32 {
    %c0_i32 = arith.constant 0 : i32
    %c0_i32_0 = arith.constant 0 : i32
    return %c0_i32 : i32
  }
  func.func @transform_2(%arg0: i32, %arg1: i32) -> (i32, i32, i32) {
    %c0_i32 = arith.constant 0 : i32
    %c0_i32_0 = arith.constant 0 : i32
    %c0_i32_1 = arith.constant 0 : i32
    return %arg1, %c0_i32, %c0_i32_0 : i32, i32, i32
  }
  func.func @transform_3(%arg0: i32, %arg1: i32) -> (i32, i32) {
    %c0_i32 = arith.constant 0 : i32
    %c0_i32_0 = arith.constant 0 : i32
    %c0_i32_1 = arith.constant 0 : i32
    return %c0_i32, %c0_i32_0 : i32, i32
  }
  func.func @transform_4(%arg0: i32, %arg1: i32) -> (i32, i32, i32, i32) {
    %c0_i32 = arith.constant 0 : i32
    %c0_i32_0 = arith.constant 0 : i32
    %c0_i32_1 = arith.constant 0 : i32
    %c0_i32_2 = arith.constant 0 : i32
    return %arg0, %c0_i32, %c0_i32_0, %c0_i32_1 : i32, i32, i32, i32
  }
  func.func @transform_5(%arg0: i32, %arg1: i32) -> (i32, i32, i32, i32) {
    %c0_i32 = arith.constant 0 : i32
    %c0_i32_0 = arith.constant 0 : i32
    %c0_i32_1 = arith.constant 0 : i32
    %c0_i32_2 = arith.constant 0 : i32
    return %arg0, %c0_i32, %c0_i32_0, %c0_i32_1 : i32, i32, i32, i32
  }
  func.func @transform_6(%arg0: i32, %arg1: i32) -> (i32, i32, i32) {
    %c0_i32 = arith.constant 0 : i32
    %c0_i32_0 = arith.constant 0 : i32
    return %arg0, %arg1, %c0_i32 : i32, i32, i32
  }
}

</mosaic_0001>

<bundles_post_ra>
// kernel: tpu_custom_call.1
= control target key start
LH: loop header
LB: loop body
LE: loop exit
PB: predicated region body
PF: predicated region fallthrough
CT: control target
= control target key end

     0   :  { %s3499_s0 = inlined_call_operand.vmem [shape: f32[2], index: 0, kind: input, shape index: {}]   ;;  %s3500_s1 = inlined_call_operand.<no memory space> [shape: s32[1], index: 1, kind: input, shape index: {}]   ;;  %s3501_s2 = inlined_call_operand.hbm [shape: f32[1,16,16], index: 2, kind: input, shape index: {}]   ;;  %s3502_s3 = inlined_call_operand.hbm [shape: f32[16,16], index: 3, kind: input, shape index: {}]   ;;  %s3503_s4 = inlined_call_operand.hbm [shape: f32[2,4,16,16], index: 4, kind: input, shape index: {}]   ;;  %s3504_s5 = inlined_call_operand.hbm [shape: f32[2,4,16,16], index: 5, kind: input, shape index: {}]   ;;  %s3505_s6 = inlined_call_operand.hbm [shape: f32[2,16,64], index: 6, kind: output, shape index: {}]  }
   0x1   :  { %3524 = sst [smem:[#allocation22_spill]] %s3499_s0 }
   0x2   :  { %3525 = sst [smem:[#allocation23_spill]] %s3505_s6 }
   0x3   :  { %11 = sst [smem:[#allocation2]] %s3500_s1 }
   0x4   :  { %12 = vsyncpa [#allocation6], 0 }
   0x5   :  { %13 = vsyncpa [#allocation4], 0 }
   0x6   :  { %14 = vsyncpa [#allocation9], 0 }
   0x7   :  { %15 = vsyncpa [#allocation5], 0 }
   0x8   :  { %17 = vsyncpa [#allocation5 + $0x1], 0  ;;  %s2915_s23 = smov 0   ;;  %s2917_s24 = smov 0  }
   0x9   :  { %s2919_s25 = smov 0   ;;  %s2921_s26 = smov 0  }
   0xa   :  { %s2923_s27 = smov 0   ;;  %s2925_s28 = smov 0  }
   0xb LB: > { %3526 = sst [smem:[#allocation18_spill]] %s2845_s23  ;;  %s2946_s1 = sadd.s32 4294967295, %s2865_s28   ;;  %s2865_s28 = sphi %s2925_s28, %s23_s28   ;;  %s2861_s27 = sphi %s2923_s27, %s3567_s27   ;;  %s2857_s26 = sphi %s2921_s26, %s3566_s26   ;;  %s2853_s25 = sphi %s2919_s25, %s3565_s25   ;;  %s2849_s24 = sphi %s2917_s24, %s3564_s24   ;;  %s2845_s23 = sphi %s2915_s23, %s3563_s23  }
   0xc   : > { %3527 = sst [smem:[#allocation19_spill]] %s2857_s26  ;;  %s2193_s29 = sadd.s32 4294967294, %s2865_s28  }
   0xd   : > { %p138_p0 = scmp.ne.s32.totalorder %s2853_s25, %s2849_s24  ;;  %p139_p1 = scmp.eq.s32.totalorder %s2865_s28, 0 }
   0xe   : > { %p144_p2 = scmp.ne.s32.totalorder %s2849_s24, %s2845_s23  ;;  %p3506_p3 = scmp.eq.s32.totalorder %s2946_s1, 0 }
   0xf   : > { %p196_p4 = scmp.eq.s32.totalorder %s2946_s1, 1  ;;  %p2957_p5 = por %p139_p1, %p138_p0 }
  0x10   : > { %p202_p6 = scmp.eq.s32.totalorder %s2193_s29, 1  ;;  %p2963_p7 = por %p3506_p3, %p144_p2 }
  0x11   : > { %p2967_p8 = por %p196_p4, %p138_p0  ;;  %p2194_p10 = scmp.ge.s32.totalorder %s2865_s28, 1 }
  0x12   : > { %s3529_s8 = scalar_select %p2963_p7, 1, 0 }
  0x13   : > { %s3530_s9 = scalar_select %p2967_p8, 1, 0 }
  0x14   : > { %p2971_p9 = por %p202_p6, %p144_p2  ;;  %p209_p11 = scmp.lt.s32.totalorder %s2865_s28, 3 }
  0x15   : > { %3531 = sst [smem:[#allocation20_spill]] %s3530_s9  ;;  %s2867_s12 = smov [#allocation7]  }
  0x16   : > { %s3532_s10 = scalar_select %p2971_p9, 1, 0 }
  0x17   : > { %p2977_p12 = pnand %p2194_p10, %p209_p11  ;;  %s238_s13 = sshll.u32 %s2867_s12, 4  ;;  %s2981_s13 = int_to_ptr.vmem [resolvable:$true] %s238_s13 }
  0x18   : > { %3533 = sst [smem:[#allocation21_spill]] %s3532_s10  ;;  %p2563_p1 = scmp.lt.s32.totalorder %s2865_s28, 2 }
  0x19   : > { %s3534_s11 = scalar_select %p2977_p12, 1, 0 }
  0x1a   : > { %p2539_p13 = pneg %p2977_p12  ;;  %p2995_p4 = pnand %p2563_p1, %p2957_p5 }
  0x1b   : > { %s35_s16 = sadd.s32 1, %s2861_s27  ;;  %s2640_s20 = scalar_lea.hbm %s3501_s2, 256 }
  0x1c   : > { %p2989_p2 = pnand %p2539_p13, %p3506_p3  ;;  %p3000_p6 = scmp.ge.s32.totalorder %s35_s16, 2 }
  0x1d   : > { %s3536_s15 = scalar_select %p2995_p4, 1, 0 }
  0x1e   : > { %s3535_s14 = scalar_select %p2989_p2, 1, 0 }
  0x1f   : > { %p2641_p10 = scmp.ne.s32.totalorder %s3501_s2, %s2640_s20  ;;  %p3012_p11 = pneg %p2989_p2 }
  0x20   : > { %p2647_p1 = scmp.lt.u32.totalorder %s2640_s20, %s3501_s2 }
  0x21   : > { %p2643_p5 = pnand %p3012_p11, %p2641_p10 }
  0x23   : > { %p2644_p13 = pneg %p2643_p5 }
  0x25   : > { %p2649_p0 = pnand %p2647_p1, %p2644_p13 }
  0x27   : > { %2652 = shalt.err (!%p2649_p0)
}
  0x28   : > { %s2653_s18 = scalar_lea.vmem %s2981_s13, 256  ;;  %p2661_p7 = scmp.lt.s32.totalorder %s2981_s13, %s2981_s13 }
  0x29   : > { %p2654_p3 = scmp.ne.s32.totalorder %s2981_s13, %s2653_s18  ;;  %p2662_p12 = scmp.lt.s32.totalorder %s2653_s18, %s2653_s18 }
  0x2b   : > { %p2656_p9 = pnand %p2654_p3, %p3012_p11  ;;  %p2663_p10 = por %p2662_p12, %p2661_p7 }
  0x2d   : > { %p2657_p8 = pneg %p2656_p9 }
  0x2f   : > { %p2664_p5 = pnand %p2663_p10, %p2657_p8 }
  0x31   : > { %2667 = shalt.err (!%p2664_p5)
}
  0x32   : > { %s3517_s19 = smov 128   ;;  %s3519_s20 = smov 8  }
  0x33   : > { %2545 = dma.hbm_to_vmem [thread:$0]  (!%p2989_p2), %s3501_s2, 256, %s2981_s13, [#allocation4], %s3517_s19, %s3517_s19, %s3519_s20  }
  0x34   : > { %s265_s7 = sand.u32 1, %s2865_s28   ;;  %s3569_s16 = smov (%p3000_p6, %s35_s16), 0 }
  0x35   : > { %s267_s12 = sand.u32 1, %s2853_s25   ;;  %s128_s18 = ssub.s32 %s2861_s27, %s3569_s16 }
  0x36   : > { %s3044_s30 = sshll.u32 %s267_s12, 6  ;;  %p129_p3 = scmp.eq.s32.totalorder %s128_s18, 0 }
  0x37   : > { %s2298_s10 = sshll.u32 %s2861_s27, 10  ;;  %s269_s23 = scalar_lea.vmem [#allocation10], %s3044_s30 }
  0x38   : > { %s276_s6 = sshll.u32 %s269_s23, 4  ;;  %s3539_s9 = sadd.s32 1, %s2853_s25  ;;  %s3060_s6 = int_to_ptr.vmem [resolvable:$true] %s276_s6 }
  0x39   : > { %s3051_s26 = scalar_select %p129_p3, %s2853_s25, %s3539_s9  }
  0x3a   : > { %s3058_s17 = scalar_lea.hbm %s3503_s4, %s2298_s10  ;;  %s3062_s22 = scalar_lea.sflag [#allocation4], %s265_s7 }
  0x3b   : > { %s2668_s12 = scalar_lea.hbm %s3058_s17, 1024  ;;  %p3521_p8 = pneg %p2995_p4 }
  0x3c   : > { %p2669_p7 = scmp.ne.s32.totalorder %s3058_s17, %s2668_s12  ;;  %s2673_s18 = scalar_lea.hbm %s3503_s4, 2048 }
  0x3d   : > { %p2674_p0 = scmp.lt.u32.totalorder %s3058_s17, %s3503_s4  ;;  %p2675_p6 = scmp.lt.u32.totalorder %s2673_s18, %s2668_s12 }
  0x3e   : > { %p2671_p9 = pnand %p3521_p8, %p2669_p7  ;;  %p2677_p1 = scmp.lt.u32.totalorder %s2668_s12, %s3058_s17 }
  0x3f   : > { %p2676_p13 = por %p2675_p6, %p2674_p0 }
  0x40   : > { %p2672_p12 = pneg %p2671_p9 }
  0x41   : > { %p2678_p10 = por %p2677_p1, %p2676_p13 }
  0x43   : > { %p2679_p5 = pnand %p2678_p10, %p2672_p12 }
  0x45   : > { %2682 = shalt.err (!%p2679_p5)
}
  0x46   : > { %s2683_s7 = scalar_lea.vmem %s3060_s6, 1024  ;;  %s2870_s23 = smov [#allocation10]  }
  0x47   : > { %p2684_p3 = scmp.ne.s32.totalorder %s3060_s6, %s2683_s7  ;;  %s2688_s9 = sshll.u32 %s2870_s23, 4  ;;  %s2689_s9 = int_to_ptr.vmem [resolvable:$false] %s2688_s9 }
  0x48   : > { %s2690_s13 = scalar_lea.vmem %s2689_s9, 2048  ;;  %p2691_p2 = scmp.lt.s32.totalorder %s3060_s6, %s2689_s9 }
  0x49   : > { %p2686_p7 = pnand %p2684_p3, %p3521_p8  ;;  %p2692_p0 = scmp.lt.s32.totalorder %s2690_s13, %s2683_s7 }
  0x4b   : > { %p2687_p9 = pneg %p2686_p7  ;;  %p2693_p6 = por %p2692_p0, %p2691_p2 }
  0x4d   : > { %p2694_p13 = pnand %p2693_p6, %p2687_p9 }
  0x4f   : > { %2697 = shalt.err (!%p2694_p13)
}
  0x50   : > { %2552 = dma.hbm_to_vmem [thread:$0]  (!%p2995_p4), %s3058_s17, 1024, %s3060_s6, %s3062_s22, %s3517_s19, %s3517_s19, %s3519_s20  }
  0x51   : > { %s3540_s0 = sld [smem:[#allocation22_spill]] }
  0x57   : > { %s222_s21 = sshll.u32 %s3540_s0, 4  ;;  %s223_s21 = int_to_ptr.vmem [resolvable:$true] %s222_s21 }
  0x58   : > { %s2698_s23 = scalar_lea.vmem %s223_s21, 16  ;;  %p2706_p10 = scmp.lt.s32.totalorder %s223_s21, %s223_s21 }
  0x59   : > { %p2699_p12 = scmp.ne.s32.totalorder %s223_s21, %s2698_s23  ;;  %p2707_p5 = scmp.lt.s32.totalorder %s2698_s23, %s2698_s23 }
  0x5b   : > { %p2701_p2 = pnand %p2699_p12, %p3012_p11  ;;  %p2708_p3 = por %p2707_p5, %p2706_p10 }
  0x5d   : > { %p2702_p1 = pneg %p2701_p2 }
  0x5f   : > { %p2709_p7 = pnand %p2708_p3, %p2702_p1 }
  0x61   : > { %2712 = shalt.err (!%p2709_p7)
}
  0x62   : > { %s2871_s7 = smov [#allocation3]   ;;  %p3541_p9 = scmp.ne.s32.totalorder %s3535_s14, 0 }
  0x63   : > { %s2872_s6 = smov [#allocation8]   ;;  %s3105_s12 = scalar_lea.hbm %s3504_s5, %s2298_s10 }
  0x64   : > { %2542 = dma.vmem_to_smem (!%p3541_p9), %s223_s21, 16, %s2871_s7, [#allocation6]  }
  0x65   : > { %s251_s17 = sshll.u32 %s2872_s6, 4  ;;  %s2713_s19 = scalar_lea.hbm %s3502_s3, 256  ;;  %s252_s17 = int_to_ptr.vmem [resolvable:$true] %s251_s17 }
  0x66   : > { %p2714_p0 = scmp.ne.s32.totalorder %s3502_s3, %s2713_s19  ;;  %p2720_p12 = scmp.lt.u32.totalorder %s2713_s19, %s3502_s3 }
  0x68   : > { %p2716_p6 = pnand %p2714_p0, %p3012_p11 }
  0x6a   : > { %p2717_p13 = pneg %p2716_p6 }
  0x6c   : > { %p2722_p2 = pnand %p2720_p12, %p2717_p13 }
  0x6e   : > { %2725 = shalt.err (!%p2722_p2)
}
  0x6f   : > { %s2726_s6 = scalar_lea.vmem %s252_s17, 256  ;;  %p2734_p3 = scmp.lt.s32.totalorder %s252_s17, %s252_s17 }
  0x70   : > { %p2727_p1 = scmp.ne.s32.totalorder %s252_s17, %s2726_s6  ;;  %p2735_p7 = scmp.lt.s32.totalorder %s2726_s6, %s2726_s6 }
  0x72   : > { %p2729_p10 = pnand %p2727_p1, %p3012_p11  ;;  %p2736_p8 = por %p2735_p7, %p2734_p3 }
  0x74   : > { %p2730_p5 = pneg %p2729_p10 }
  0x76   : > { %p2737_p4 = pnand %p2736_p8, %p2730_p5 }
  0x78   : > { %2740 = shalt.err (!%p2737_p4)
}
  0x79   : > { %s3542_s0 = smov 8   ;;  %s3543_s10 = smov 128  }
  0x7a   : > { %2548 = dma.hbm_to_vmem [thread:$0]  (!%p3541_p9), %s3502_s3, 256, %s252_s17, [#allocation9], %s3543_s10, %s3543_s10, %s3542_s0  }
  0x7b   : > { %s290_s29 = scalar_lea.vmem [#allocation11], %s3044_s30  ;;  %s2741_s13 = scalar_lea.hbm %s3105_s12, 1024 }
  0x7c   : > { %s297_s9 = sshll.u32 %s290_s29, 4  ;;  %p2742_p4 = scmp.ne.s32.totalorder %s3105_s12, %s2741_s13  ;;  %s3129_s9 = int_to_ptr.vmem [resolvable:$true] %s297_s9 }
  0x7d   : > { %p3544_p11 = scmp.ne.s32.totalorder %s3536_s15, 0  ;;  %s2746_s23 = scalar_lea.hbm %s3504_s5, 2048 }
  0x7e   : > { %p2747_p13 = scmp.lt.u32.totalorder %s3105_s12, %s3504_s5  ;;  %p2748_p12 = scmp.lt.u32.totalorder %s2746_s23, %s2741_s13 }
  0x7f   : > { %p3545_p8 = pneg %p3544_p11  ;;  %p2750_p2 = scmp.lt.u32.totalorder %s2741_s13, %s3105_s12 }
  0x80   : > { %p2749_p9 = por %p2748_p12, %p2747_p13 }
  0x81   : > { %p2744_p0 = pnand %p2742_p4, %p3545_p8 }
  0x82   : > { %p2751_p1 = por %p2750_p2, %p2749_p9 }
  0x83   : > { %p2745_p6 = pneg %p2744_p0 }
  0x85   : > { %p2752_p10 = pnand %p2751_p1, %p2745_p6 }
  0x87   : > { %2755 = shalt.err (!%p2752_p10)
}
  0x88   : > { %s2756_s30 = scalar_lea.vmem %s3129_s9, 1024  ;;  %p3546_p3 = pmov %p3545_p8 }
  0x89   : > { %p2757_p5 = scmp.ne.s32.totalorder %s3129_s9, %s2756_s30  ;;  %s2873_s17 = smov [#allocation11]  }
  0x8a   : > { %s2761_s6 = sshll.u32 %s2873_s17, 4  ;;  %s2762_s6 = int_to_ptr.vmem [resolvable:$false] %s2761_s6 }
  0x8b   : > { %p2759_p7 = pnand %p2757_p5, %p3546_p3  ;;  %s2763_s20 = scalar_lea.vmem %s2762_s6, 2048 }
  0x8c   : > { %p2764_p8 = scmp.lt.s32.totalorder %s3129_s9, %s2762_s6  ;;  %p2765_p0 = scmp.lt.s32.totalorder %s2763_s20, %s2756_s30 }
  0x8d   : > { %p2760_p4 = pneg %p2759_p7 }
  0x8e   : > { %p2766_p13 = por %p2765_p0, %p2764_p8 }
  0x90   : > { %p2767_p12 = pnand %p2766_p13, %p2760_p4 }
  0x92   : > { %2770 = shalt.err (!%p2767_p12)
}
  0x93   : > { %2555 = dma.hbm_to_vmem [thread:$0]  (!%p3544_p11), %s3105_s12, 1024, %s3129_s9, %s3062_s22, %s3543_s10, %s3543_s10, %s3542_s0  }
  0x94   : > { %p3547_p6 = scmp.ne.s32.totalorder %s3534_s11, 0 }
  0x95   : > { %p3548_p9 = scmp.eq.s32.totalorder (!%p3547_p6), %s2946_s1, 0 }
  0x96   : > { %309 = sbr.rel (%p3547_p6) target bundleno = 964 (0x3c4), region = 44 }
  0x9d   : > { %2824 = dma.done.wait (%p3548_p9), [#allocation6], 16   ;;  %p3549_p2 = pmov %p3548_p9 }
  0x9f   : > { %2826 = vsyncadd (%p3549_p2), [#allocation6], 4294967280  ;;  %p3550_p1 = pmov %p3549_p2 }
  0xa1   : > { %2828 = dma.done.wait (%p3550_p1), [#allocation4], 256   ;;  %p3551_p10 = pmov %p3550_p1 }
  0xa2   : > { %p3552_p5 = pmov %p3550_p1 }
  0xa3   : > { %2830 = vsyncadd (%p3551_p10), [#allocation4], 4294967040 }
  0xa4   : > { %2832 = dma.done.wait (%p3552_p5), [#allocation9], 256   ;;  %p3553_p11 = pmov %p3550_p1 }
  0xa5   : > { %s323_s11 = sand.u32 1, %s2946_s1   ;;  %s3174_s15 = sand.u32 1, %s2849_s24  }
  0xa6   : > { %2834 = vsyncadd (%p3553_p11), [#allocation9], 4294967040  ;;  %s2209_s22 = sshll.u32 %s3174_s15, 6  ;;  %s324_s12 = scalar_lea.sflag [#allocation4], %s323_s11 }
  0xa7   : > { %s327_s0 = scalar_lea.vmem [#allocation10], %s2209_s22  ;;  %p3554_p3 = scmp.ne.s32.totalorder %s3529_s8, 0 }
  0xa9   : > { %2836 = dma.done.wait (%p3554_p3), %s324_s12, 2048  }
  0xaa   : > { %2838 = vsyncadd (%p3554_p3), %s324_s12, 4294965248  ;;  %s336_s10 = scalar_lea.vmem [#allocation11], %s2209_s22 }
  0xab   : > { %341 = sfence }
  0xac   : > { %v377_v0 = vld [vmem:[#allocation8] sm:$0xff]  ;;  %v378_v1 = vld [vmem:[#allocation8 + $0x8] sm:$0xff]  ;;  %s374_s19 = sld [smem:[#allocation2]]  ;;  %vm421_vm0 = vcmask 130048   ;;  %v375_v44 = vld [vmem:[#allocation7] sm:$0xff]  ;;  %s372_s29 = sld [smem:[#allocation3]] }
  0xad   : > { %v2513_v2 = vpack.c.bf16 %v378_v1, %v377_v0  ;;  %v376_v45 = vld [vmem:[#allocation7 + $0x8] sm:$0xff]  ;;  %s2212_s9 = sld [smem:[#allocation3 + $0x1]]  ;;  %s3556_s14 = sld [smem:[#allocation20_spill]]  ;;  %vm2034_vm1 = vcmask 523264  }
  0xae   : > { %v2517_v47 = vpack.c.bf16 %v376_v45, %v375_v44  ;;  %s3555_s13 = sld [smem:[#allocation19_spill]]  ;;  %s2211_s18 = sshll.u32 %s3174_s15, 4 }
  0xaf   : > { %2514 = vmatprep.subr.bf16.mxu0 %v2513_v2  ;;  %s370_s23 = scalar_lea.vmem [#allocation12], %s2211_s18  ;;  %s3557_s6 = sld [smem:[#allocation23_spill]] }
  0xb0   : > { %2516 = vmatpush3.bf16.msra.mxu0 %v2513_v2  ;;  %2518 = vmatprep.subr.bf16.mxu1 %v2517_v47  ;;  %s2053_s21 = sshll.u32 %s370_s23, 4  ;;  %s2038_s11 = scalar_lea.sflag [#allocation5], %s3174_s15  ;;  %s3445_s21 = int_to_ptr.vmem [resolvable:$true] %s2053_s21 }
  0xb1   : > { %2520 = vmatpush3.bf16.msra.mxu1 %v2517_v47  ;;  %s2771_s22 = scalar_lea.vmem %s3445_s21, 256  ;;  %s2874_s12 = smov [#allocation12]  }
  0xb2   : > { %s379_s1 = scalar_lea.vmem %s327_s0, %s374_s19 [#allocation10]  ;;  %s388_s8 = scalar_lea.vmem %s336_s10, %s374_s19 [#allocation11] }
  0xb3   : > { %v3181_v3 = vld [vmem:[%s379_s1] sm:$0xff]  ;;  %v3183_v4 = vld [vmem:[%s379_s1 + $0x8] sm:$0xff]  ;;  %v3185_v5 = vld [vmem:[%s379_s1 + $0x10] sm:$0xff]  ;;  %p2772_p7 = scmp.ne.s32.totalorder %s3445_s21, %s2771_s22  ;;  %p3558_p4 = scmp.ne.s32.totalorder %s3556_s14, 0 }
  0xb4   : > { %2389 = vmatprep.mubr.msk.f32.mxu0 %vm421_vm0, %v3181_v3  ;;  %v3193_v6 = vld [vmem:[%s379_s1 + $0x18] sm:$0xff]  ;;  %v3195_v7 = vld [vmem:[%s379_s1 + $0x20] sm:$0xff]  ;;  %v3201_v8 = vld [vmem:[%s379_s1 + $0x28] sm:$0xff]  ;;  %v397_v18 = vmul.f32 %v3181_v3, %v3181_v3  ;;  %v398_v20 = vmul.f32 %v3183_v4, %v3183_v4  ;;  %v399_v21 = vmul.f32 %v3185_v5, %v3185_v5  ;;  %s2300_s7 = sshll.u32 %s3555_s13, 8  ;;  %s2775_s0 = sshll.u32 %s2874_s12, 4  ;;  %s2776_s0 = int_to_ptr.vmem [resolvable:$false] %s2775_s0 }
  0xb5   : > { %2390 = vmatmul.mubr.msk.f32.vlgmr.msra.gmra.mrb[0].mxu0 %vm421_vm0, %v3183_v4  ;;  %v3203_v9 = vld [vmem:[%s379_s1 + $0x30] sm:$0xff]  ;;  %v387_v10 = vld [vmem:[%s379_s1 + $0x38] sm:$0xff]  ;;  %v389_v11 = vld [vmem:[%s388_s8] sm:$0xff]  ;;  %v400_v22 = vmul.f32 %v3193_v6, %v3193_v6  ;;  %v401_v23 = vmul.f32 %v3195_v7, %v3195_v7  ;;  %v402_v24 = vmul.f32 %v3201_v8, %v3201_v8  ;;  %s3450_s20 = scalar_lea.hbm %s3557_s6, %s2300_s7  ;;  %p2773_p8 = pnand %p2772_p7, %p3558_p4 }
  0xb6   : > { %2392 = vmatprep.mubr.msk.f32.mxu0 %vm421_vm0, %v3185_v5  ;;  %v390_v12 = vld [vmem:[%s388_s8 + $0x8] sm:$0xff]  ;;  %v391_v13 = vld [vmem:[%s388_s8 + $0x10] sm:$0xff]  ;;  %v392_v14 = vld [vmem:[%s388_s8 + $0x18] sm:$0xff]  ;;  %v403_v25 = vmul.f32 %v3203_v9, %v3203_v9  ;;  %v404_v26 = vmul.f32 %v387_v10, %v387_v10  ;;  %v405_v27 = vmul.f32 %v389_v11, %v389_v11  ;;  %v413_v35 = vmul.f32 %v389_v11, %v3181_v3  ;;  %s2777_s10 = scalar_lea.vmem %s2776_s0, 512  ;;  %p2778_p13 = scmp.lt.s32.totalorder %s3445_s21, %s2776_s0 }
  0xb7   : > { %v393_v15 = vld [vmem:[%s388_s8 + $0x20] sm:$0xff]  ;;  %v394_v16 = vld [vmem:[%s388_s8 + $0x28] sm:$0xff]  ;;  %v395_v17 = vld [vmem:[%s388_s8 + $0x30] sm:$0xff]  ;;  %v406_v28 = vmul.f32 %v390_v12, %v390_v12  ;;  %v407_v29 = vmul.f32 %v391_v13, %v391_v13  ;;  %v408_v30 = vmul.f32 %v392_v14, %v392_v14  ;;  %v414_v36 = vmul.f32 %v390_v12, %v3183_v4  ;;  %p2774_p0 = pneg %p2773_p8  ;;  %p2779_p12 = scmp.lt.s32.totalorder %s2777_s10, %s2771_s22 }
  0xb8   : > { %v396_v19 = vld [vmem:[%s388_s8 + $0x38] sm:$0xff]  ;;  %v409_v31 = vmul.f32 %v393_v15, %v393_v15  ;;  %v410_v32 = vmul.f32 %v394_v16, %v394_v16  ;;  %v411_v33 = vmul.f32 %v395_v17, %v395_v17  ;;  %v415_v37 = vmul.f32 %v391_v13, %v3185_v5 }
  0xb9   : > { %2393 = vmatmul.mubr.msk.f32.gmra.mrb[2].mxu0 %vm421_vm0, %v3193_v6  ;;  %v412_v34 = vmul.f32 %v396_v19, %v396_v19  ;;  %v416_v38 = vmul.f32 %v392_v14, %v3193_v6  ;;  %v417_v39 = vmul.f32 %v393_v15, %v3195_v7  ;;  %v418_v40 = vmul.f32 %v394_v16, %v3201_v8  ;;  %p2780_p6 = por %p2779_p12, %p2778_p13 }
  0xba   : > { %2395 = vmatprep.mubr.msk.f32.mxu0 %vm421_vm0, %v3195_v7  ;;  %v419_v41 = vmul.f32 %v395_v17, %v3203_v9  ;;  %v420_v42 = vmul.f32 %v396_v19, %v387_v10 }
  0xbb   : > { %p2781_p9 = pnand %p2780_p6, %p2774_p0 }
  0xbd   : > { %2396 = vmatmul.mubr.msk.f32.gmra.mrb[4].mxu0 %vm421_vm0, %v3201_v8 }
  0xbe   : > { %2398 = vmatprep.mubr.msk.f32.mxu0 %vm421_vm0, %v3203_v9 }
  0xc1   : > { %2399 = vmatmul.mubr.msk.f32.gmra.mrb[6].mxu0 %vm421_vm0, %v387_v10 }
  0xc2   : > { %2401 = vmatprep.mubr.msk.f32.mxu0 %vm421_vm0, %v389_v11 }
  0xc5   : > { %2402 = vmatmul.mubr.msk.f32.gmra.mrb[8].mxu0 %vm421_vm0, %v390_v12 }
  0xc6   : > { %2404 = vmatprep.mubr.msk.f32.mxu0 %vm421_vm0, %v391_v13 }
  0xc9   : > { %2405 = vmatmul.mubr.msk.f32.gmra.mrb[10].mxu0 %vm421_vm0, %v392_v14 }
  0xca   : > { %2407 = vmatprep.mubr.msk.f32.mxu0 %vm421_vm0, %v393_v15 }
  0xcd   : > { %2408 = vmatmul.mubr.msk.f32.gmra.mrb[12].mxu0 %vm421_vm0, %v394_v16 }
  0xce   : > { %2410 = vmatprep.mubr.msk.f32.mxu0 %vm421_vm0, %v395_v17 }
  0xd1   : > { %2411 = vmatmul.mubr.msk.f32.gmra.mrb[14].mxu0 %vm421_vm0, %v396_v19 }
  0xd2   : > { %2413 = vmatprep.mubr.msk.f32.mxu0 %vm421_vm0, %v397_v18 }
  0xd5   : > { %2414 = vmatmul.mubr.msk.f32.gmra.mrb[16].mxu0 %vm421_vm0, %v398_v20 }
  0xd6   : > { %2416 = vmatprep.mubr.msk.f32.mxu0 %vm421_vm0, %v399_v21 }
  0xd9   : > { %2417 = vmatmul.mubr.msk.f32.gmra.mrb[18].mxu0 %vm421_vm0, %v400_v22 }
  0xda   : > { %2419 = vmatprep.mubr.msk.f32.mxu0 %vm421_vm0, %v401_v23 }
  0xdd   : > { %2420 = vmatmul.mubr.msk.f32.gmra.mrb[20].mxu0 %vm421_vm0, %v402_v24 }
  0xde   : > { %2422 = vmatprep.mubr.msk.f32.mxu0 %vm421_vm0, %v403_v25 }
  0xe1   : > { %2423 = vmatmul.mubr.msk.f32.gmra.mrb[22].mxu0 %vm421_vm0, %v404_v26 }
  0xe2   : > { %2425 = vmatprep.mubr.msk.f32.mxu0 %vm421_vm0, %v405_v27 }
  0xe5   : > { %2426 = vmatmul.mubr.msk.f32.gmra.mrb[24].mxu0 %vm421_vm0, %v406_v28 }
  0xe6   : > { %2428 = vmatprep.mubr.msk.f32.mxu0 %vm421_vm0, %v407_v29 }
  0xe9   : > { %2429 = vmatmul.mubr.msk.f32.gmra.mrb[26].mxu0 %vm421_vm0, %v408_v30 }
  0xea   : > { %2431 = vmatprep.mubr.msk.f32.mxu0 %vm421_vm0, %v409_v31 }
  0xed   : > { %2432 = vmatmul.mubr.msk.f32.gmra.mrb[28].mxu0 %vm421_vm0, %v410_v32 }
  0xee   : > { %2434 = vmatprep.mubr.msk.f32.mxu0 %vm421_vm0, %v411_v33 }
  0xf1   : > { %2435 = vmatmul.mubr.msk.f32.gmra.mrb[30].mxu0 %vm421_vm0, %v412_v34 }
  0xf2   : > { %2437 = vmatprep.mubr.msk.f32.mxu0 %vm421_vm0, %v413_v35 }
  0xf5   : > { %2438 = vmatmul.mubr.msk.f32.gmra.mrb[32].mxu0 %vm421_vm0, %v414_v36 }
  0xf6   : > { %2440 = vmatprep.mubr.msk.f32.mxu0 %vm421_vm0, %v415_v37 }
  0xf9   : > { %2441 = vmatmul.mubr.msk.f32.gmra.mrb[34].mxu0 %vm421_vm0, %v416_v38 }
  0xfa   : > { %2443 = vmatprep.mubr.msk.f32.mxu0 %vm421_vm0, %v417_v39 }
  0xfd   : > { %2444 = vmatmul.mubr.msk.f32.gmra.mrb[36].mxu0 %vm421_vm0, %v418_v40 }
  0xfe   : > { %2446 = vmatprep.mubr.msk.f32.mxu0 %vm421_vm0, %v419_v41 }
 0x101   : > { %2447 = vmatmul.mubr.msk.f32.gmra.mrb[38].mxu0 %vm421_vm0, %v420_v42 }
 0x188   : > { %v2391_v43 = vpop.f32.mrb[0].mxu0 }
 0x189   : > { %v608_v46 = vpop.f32.mrb[1].mxu0 }
 0x18a   : > { %807 = vxpose.xlu0.b32.start [1/2] (short) (narrow) %v608_v46, 16 }
 0x18c   : > { %v2394_v48 = vpop.f32.mrb[2].mxu0 }
 0x18d   : > { %v618_v49 = vpop.f32.mrb[3].mxu0 }
 0x18e   : > { %808 = vxpose.xlu0.b32.end [2/2] (short) (narrow) %v2391_v43, 16  ;;  %839 = vxpose.xlu1.b32.start [1/2] (short) (narrow) %v618_v49, 16 }
 0x190   : > { %v2397_v50 = vpop.f32.mrb[4].mxu0 }
 0x191   : > { %v628_v51 = vpop.f32.mrb[5].mxu0 }
 0x192   : > { %840 = vxpose.xlu1.b32.end [2/2] (short) (narrow) %v2394_v48, 16  ;;  %871 = vxpose.xlu0.b32.start [1/2] (short) (narrow) %v628_v51, 16 }
 0x194   : > { %v2400_v52 = vpop.f32.mrb[6].mxu0 }
 0x195   : > { %v638_v53 = vpop.f32.mrb[7].mxu0 }
 0x196   : > { %872 = vxpose.xlu0.b32.end [2/2] (short) (narrow) %v2397_v50, 16  ;;  %903 = vxpose.xlu1.b32.start [1/2] (short) (narrow) %v638_v53, 16 }
 0x198   : > { %v2403_v54 = vpop.f32.mrb[8].mxu0 }
 0x199   : > { %v648_v55 = vpop.f32.mrb[9].mxu0 }
 0x19a   : > { %904 = vxpose.xlu1.b32.end [2/2] (short) (narrow) %v2400_v52, 16  ;;  %935 = vxpose.xlu0.b32.start [1/2] (short) (narrow) %v648_v55, 16 }
 0x19c   : > { %v2406_v56 = vpop.f32.mrb[10].mxu0 }
 0x19d   : > { %v658_v57 = vpop.f32.mrb[11].mxu0 }
 0x19e   : > { %936 = vxpose.xlu0.b32.end [2/2] (short) (narrow) %v2403_v54, 16  ;;  %967 = vxpose.xlu1.b32.start [1/2] (short) (narrow) %v658_v57, 16 }
 0x1a0   : > { %v2409_v58 = vpop.f32.mrb[12].mxu0 }
 0x1a1   : > { %v668_v59 = vpop.f32.mrb[13].mxu0 }
 0x1a2   : > { %968 = vxpose.xlu1.b32.end [2/2] (short) (narrow) %v2406_v56, 16  ;;  %999 = vxpose.xlu0.b32.start [1/2] (short) (narrow) %v668_v59, 16 }
 0x1a4   : > { %v2412_v60 = vpop.f32.mrb[14].mxu0 }
 0x1a5   : > { %v678_v61 = vpop.f32.mrb[15].mxu0 }
 0x1a6   : > { %1000 = vxpose.xlu0.b32.end [2/2] (short) (narrow) %v2409_v58, 16  ;;  %1031 = vxpose.xlu1.b32.start [1/2] (short) (narrow) %v678_v61, 16 }
 0x1a8   : > { %v2415_v62 = vpop.f32.mrb[16].mxu0 }
 0x1a9   : > { %v688_v63 = vpop.f32.mrb[17].mxu0 }
 0x1aa   : > { %1032 = vxpose.xlu1.b32.end [2/2] (short) (narrow) %v2412_v60, 16  ;;  %1063 = vxpose.xlu0.b32.start [1/2] (short) (narrow) %v688_v63, 16 }
 0x1ac   : > { %v2418_v0 = vpop.f32.mrb[18].mxu0 }
 0x1ad   : > { %v698_v1 = vpop.f32.mrb[19].mxu0 }
 0x1ae   : > { %1064 = vxpose.xlu0.b32.end [2/2] (short) (narrow) %v2415_v62, 16  ;;  %1095 = vxpose.xlu1.b32.start [1/2] (short) (narrow) %v698_v1, 16 }
 0x1b0   : > { %v2421_v2 = vpop.f32.mrb[20].mxu0 }
 0x1b1   : > { %v708_v3 = vpop.f32.mrb[21].mxu0 }
 0x1b2   : > { %1096 = vxpose.xlu1.b32.end [2/2] (short) (narrow) %v2418_v0, 16  ;;  %1127 = vxpose.xlu0.b32.start [1/2] (short) (narrow) %v708_v3, 16 }
 0x1b4   : > { %v2424_v4 = vpop.f32.mrb[22].mxu0 }
 0x1b5   : > { %v718_v5 = vpop.f32.mrb[23].mxu0 }
 0x1b6   : > { %1128 = vxpose.xlu0.b32.end [2/2] (short) (narrow) %v2421_v2, 16  ;;  %1159 = vxpose.xlu1.b32.start [1/2] (short) (narrow) %v718_v5, 16 }
 0x1b8   : > { %v2427_v6 = vpop.f32.mrb[24].mxu0 }
 0x1b9   : > { %v728_v7 = vpop.f32.mrb[25].mxu0 }
 0x1ba   : > { %1160 = vxpose.xlu1.b32.end [2/2] (short) (narrow) %v2424_v4, 16  ;;  %1191 = vxpose.xlu0.b32.start [1/2] (short) (narrow) %v728_v7, 16 }
 0x1bc   : > { %v2430_v8 = vpop.f32.mrb[26].mxu0 }
 0x1bd   : > { %v738_v9 = vpop.f32.mrb[27].mxu0 }
 0x1be   : > { %1192 = vxpose.xlu0.b32.end [2/2] (short) (narrow) %v2427_v6, 16  ;;  %1223 = vxpose.xlu1.b32.start [1/2] (short) (narrow) %v738_v9, 16 }
 0x1c0   : > { %v2433_v10 = vpop.f32.mrb[28].mxu0 }
 0x1c1   : > { %v748_v11 = vpop.f32.mrb[29].mxu0 }
 0x1c2   : > { %1224 = vxpose.xlu1.b32.end [2/2] (short) (narrow) %v2430_v8, 16  ;;  %1255 = vxpose.xlu0.b32.start [1/2] (short) (narrow) %v748_v11, 16 }
 0x1c4   : > { %v2436_v12 = vpop.f32.mrb[30].mxu0 }
 0x1c5   : > { %v758_v13 = vpop.f32.mrb[31].mxu0 }
 0x1c6   : > { %1256 = vxpose.xlu0.b32.end [2/2] (short) (narrow) %v2433_v10, 16  ;;  %1287 = vxpose.xlu1.b32.start [1/2] (short) (narrow) %v758_v13, 16 }
 0x1c8   : > { %v2439_v14 = vpop.f32.mrb[32].mxu0 }
 0x1c9   : > { %v768_v15 = vpop.f32.mrb[33].mxu0 }
 0x1ca   : > { %1288 = vxpose.xlu1.b32.end [2/2] (short) (narrow) %v2436_v12, 16  ;;  %1319 = vxpose.xlu0.b32.start [1/2] (short) (narrow) %v768_v15, 16 }
 0x1cc   : > { %v2442_v16 = vpop.f32.mrb[34].mxu0 }
 0x1cd   : > { %v778_v17 = vpop.f32.mrb[35].mxu0 }
 0x1ce   : > { %1320 = vxpose.xlu0.b32.end [2/2] (short) (narrow) %v2439_v14, 16  ;;  %1351 = vxpose.xlu1.b32.start [1/2] (short) (narrow) %v778_v17, 16 }
 0x1d0   : > { %v2445_v18 = vpop.f32.mrb[36].mxu0 }
 0x1d1   : > { %v788_v19 = vpop.f32.mrb[37].mxu0 }
 0x1d2   : > { %1352 = vxpose.xlu1.b32.end [2/2] (short) (narrow) %v2442_v16, 16  ;;  %1383 = vxpose.xlu0.b32.start [1/2] (short) (narrow) %v788_v19, 16 }
 0x1d4   : > { %v2448_v20 = vpop.f32.mrb[38].mxu0 }
 0x1d5   : > { %v798_v21 = vpop.f32.mrb[39].mxu0 }
 0x1d6   : > { %1384 = vxpose.xlu0.b32.end [2/2] (short) (narrow) %v2445_v18, 16  ;;  %1415 = vxpose.xlu1.b32.start [1/2] (short) (narrow) %v798_v21, 16 }
 0x1da   : > { %1416 = vxpose.xlu1.b32.end [2/2] (short) (narrow) %v2448_v20, 16 }
 0x20a   : > { %v823_v22 = vpop.trf.xlu0 }
 0x20b   : > { %2453 = vmatprep.mubr.msk.f32.mxu1 %vm421_vm0, %v823_v22 }
 0x20e   : > { %v824_v23 = vpop.trf.xlu0  ;;  %v855_v24 = vpop.trf.xlu1 }
 0x20f   : > { %2454 = vmatmul.mubr.msk.f32.vlgmr.msra.gmra.mrb[0].mxu1 %vm421_vm0, %v824_v23 }
 0x210   : > { %2456 = vmatprep.mubr.msk.f32.mxu1 %vm421_vm0, %v855_v24 }
 0x212   : > { %v856_v25 = vpop.trf.xlu1  ;;  %v887_v26 = vpop.trf.xlu0 }
 0x213   : > { %2457 = vmatmul.mubr.msk.f32.gmra.mrb[2].mxu1 %vm421_vm0, %v856_v25 }
 0x214   : > { %2459 = vmatprep.mubr.msk.f32.mxu1 %vm421_vm0, %v887_v26 }
 0x216   : > { %v888_v27 = vpop.trf.xlu0  ;;  %v919_v28 = vpop.trf.xlu1 }
 0x217   : > { %2460 = vmatmul.mubr.msk.f32.gmra.mrb[4].mxu1 %vm421_vm0, %v888_v27 }
 0x218   : > { %2462 = vmatprep.mubr.msk.f32.mxu1 %vm421_vm0, %v919_v28 }
 0x21a   : > { %v920_v29 = vpop.trf.xlu1  ;;  %v951_v30 = vpop.trf.xlu0 }
 0x21b   : > { %2463 = vmatmul.mubr.msk.f32.gmra.mrb[6].mxu1 %vm421_vm0, %v920_v29 }
 0x21c   : > { %2465 = vmatprep.mubr.msk.f32.mxu1 %vm421_vm0, %v951_v30 }
 0x21e   : > { %v952_v31 = vpop.trf.xlu0  ;;  %v983_v32 = vpop.trf.xlu1 }
 0x21f   : > { %2466 = vmatmul.mubr.msk.f32.gmra.mrb[8].mxu1 %vm421_vm0, %v952_v31 }
 0x220   : > { %2468 = vmatprep.mubr.msk.f32.mxu1 %vm421_vm0, %v983_v32 }
 0x222   : > { %v984_v33 = vpop.trf.xlu1  ;;  %v1015_v34 = vpop.trf.xlu0 }
 0x223   : > { %2469 = vmatmul.mubr.msk.f32.gmra.mrb[10].mxu1 %vm421_vm0, %v984_v33 }
 0x224   : > { %2471 = vmatprep.mubr.msk.f32.mxu1 %vm421_vm0, %v1015_v34 }
 0x226   : > { %v1016_v35 = vpop.trf.xlu0  ;;  %v1047_v36 = vpop.trf.xlu1 }
 0x227   : > { %2472 = vmatmul.mubr.msk.f32.gmra.mrb[12].mxu1 %vm421_vm0, %v1016_v35 }
 0x228   : > { %2474 = vmatprep.mubr.msk.f32.mxu1 %vm421_vm0, %v1047_v36 }
 0x22a   : > { %v1048_v37 = vpop.trf.xlu1  ;;  %v1079_v38 = vpop.trf.xlu0 }
 0x22b   : > { %2475 = vmatmul.mubr.msk.f32.gmra.mrb[14].mxu1 %vm421_vm0, %v1048_v37 }
 0x22c   : > { %2477 = vmatprep.mubr.msk.f32.mxu1 %vm421_vm0, %v1079_v38 }
 0x22e   : > { %v1080_v39 = vpop.trf.xlu0  ;;  %v1111_v40 = vpop.trf.xlu1 }
 0x22f   : > { %2478 = vmatmul.mubr.msk.f32.gmra.mrb[16].mxu1 %vm421_vm0, %v1080_v39 }
 0x230   : > { %2480 = vmatprep.mubr.msk.f32.mxu1 %vm421_vm0, %v1111_v40 }
 0x232   : > { %v1112_v41 = vpop.trf.xlu1  ;;  %v1143_v42 = vpop.trf.xlu0 }
 0x233   : > { %2481 = vmatmul.mubr.msk.f32.gmra.mrb[18].mxu1 %vm421_vm0, %v1112_v41 }
 0x234   : > { %2483 = vmatprep.mubr.msk.f32.mxu1 %vm421_vm0, %v1143_v42 }
 0x236   : > { %v1144_v43 = vpop.trf.xlu0  ;;  %v1175_v44 = vpop.trf.xlu1 }
 0x237   : > { %2484 = vmatmul.mubr.msk.f32.gmra.mrb[20].mxu1 %vm421_vm0, %v1144_v43 }
 0x238   : > { %2486 = vmatprep.mubr.msk.f32.mxu1 %vm421_vm0, %v1175_v44 }
 0x23a   : > { %v1176_v45 = vpop.trf.xlu1  ;;  %v1207_v46 = vpop.trf.xlu0 }
 0x23b   : > { %2487 = vmatmul.mubr.msk.f32.gmra.mrb[22].mxu1 %vm421_vm0, %v1176_v45 }
 0x23c   : > { %2489 = vmatprep.mubr.msk.f32.mxu1 %vm421_vm0, %v1207_v46 }
 0x23e   : > { %v1208_v47 = vpop.trf.xlu0  ;;  %v1239_v48 = vpop.trf.xlu1 }
 0x23f   : > { %2490 = vmatmul.mubr.msk.f32.gmra.mrb[24].mxu1 %vm421_vm0, %v1208_v47 }
 0x240   : > { %2492 = vmatprep.mubr.msk.f32.mxu1 %vm421_vm0, %v1239_v48 }
 0x242   : > { %v1240_v49 = vpop.trf.xlu1  ;;  %v1271_v50 = vpop.trf.xlu0 }
 0x243   : > { %2493 = vmatmul.mubr.msk.f32.gmra.mrb[26].mxu1 %vm421_vm0, %v1240_v49 }
 0x244   : > { %2495 = vmatprep.mubr.msk.f32.mxu1 %vm421_vm0, %v1271_v50 }
 0x246   : > { %v1272_v51 = vpop.trf.xlu0  ;;  %v1303_v52 = vpop.trf.xlu1 }
 0x247   : > { %2496 = vmatmul.mubr.msk.f32.gmra.mrb[28].mxu1 %vm421_vm0, %v1272_v51 }
 0x248   : > { %2498 = vmatprep.mubr.msk.f32.mxu1 %vm421_vm0, %v1303_v52 }
 0x24a   : > { %v1304_v53 = vpop.trf.xlu1  ;;  %v1335_v54 = vpop.trf.xlu0 }
 0x24b   : > { %2499 = vmatmul.mubr.msk.f32.gmra.mrb[30].mxu1 %vm421_vm0, %v1304_v53 }
 0x24c   : > { %2501 = vmatprep.mubr.msk.f32.mxu1 %vm421_vm0, %v1335_v54 }
 0x24e   : > { %v1336_v55 = vpop.trf.xlu0  ;;  %v1367_v56 = vpop.trf.xlu1 }
 0x24f   : > { %2502 = vmatmul.mubr.msk.f32.gmra.mrb[32].mxu1 %vm421_vm0, %v1336_v55 }
 0x250   : > { %2504 = vmatprep.mubr.msk.f32.mxu1 %vm421_vm0, %v1367_v56 }
 0x252   : > { %v1368_v57 = vpop.trf.xlu1  ;;  %v1399_v58 = vpop.trf.xlu0 }
 0x253   : > { %2505 = vmatmul.mubr.msk.f32.gmra.mrb[34].mxu1 %vm421_vm0, %v1368_v57 }
 0x254   : > { %2507 = vmatprep.mubr.msk.f32.mxu1 %vm421_vm0, %v1399_v58 }
 0x256   : > { %v1400_v59 = vpop.trf.xlu0  ;;  %v1431_v60 = vpop.trf.xlu1 }
 0x257   : > { %2508 = vmatmul.mubr.msk.f32.gmra.mrb[36].mxu1 %vm421_vm0, %v1400_v59 }
 0x258   : > { %2510 = vmatprep.mubr.msk.f32.mxu1 %vm421_vm0, %v1431_v60 }
 0x25a   : > { %v1432_v61 = vpop.trf.xlu1 }
 0x25b   : > { %2511 = vmatmul.mubr.msk.f32.gmra.mrb[38].mxu1 %vm421_vm0, %v1432_v61 }
 0x2e2   : > { %v2455_v62 = vpop.f32.mrb[0].mxu1 }
 0x2e3   : > { %v1633_v63 = vpop.f32.mrb[1].mxu1  ;;  %v1833_v7 = vmul.f32 %v2455_v62, %v2455_v62 }
 0x2e4   : > { %v1832_v11 = vmul.f32 %v1633_v63, %v1633_v63 }
 0x2e6   : > { %v2458_v0 = vpop.f32.mrb[2].mxu1 }
 0x2e7   : > { %v1643_v1 = vpop.f32.mrb[3].mxu1  ;;  %v3311_v17 = vmul.f32 %v2458_v0, %v2458_v0 }
 0x2e8   : > { %v3317_v21 = vmul.f32 %v1643_v1, %v1643_v1 }
 0x2ea   : > { %v2461_v2 = vpop.f32.mrb[4].mxu1 }
 0x2eb   : > { %v1653_v3 = vpop.f32.mrb[5].mxu1  ;;  %v3331_v27 = vmul.f32 %v2461_v2, %v2461_v2 }
 0x2ec   : > { %v3337_v31 = vmul.f32 %v1653_v3, %v1653_v3 }
 0x2ee   : > { %v2464_v4 = vpop.f32.mrb[6].mxu1 }
 0x2ef   : > { %v1663_v5 = vpop.f32.mrb[7].mxu1  ;;  %v3351_v37 = vmul.f32 %v2464_v4, %v2464_v4 }
 0x2f0   : > { %v3357_v41 = vmul.f32 %v1663_v5, %v1663_v5 }
 0x2f2   : > { %v2467_v6 = vpop.f32.mrb[8].mxu1 }
 0x2f3   : > { %v1841_v8 = vmul.f32 %v2467_v6, %v2467_v6  ;;  %v3303_v9 = vmul.f32 %v2467_v6, %v2455_v62  ;;  %v1673_v10 = vpop.f32.mrb[9].mxu1  ;;  %v3379_v6 = vstv %s2212_s9 }
 0x2f4   : > { %v1840_v12 = vmul.f32 %v1673_v10, %v1673_v10  ;;  %v3305_v13 = vmul.f32 %v1673_v10, %v1633_v63 }
 0x2f5   : > { %v3307_v14 = vadd.f32 %v1841_v8, %v1833_v7 }
 0x2f6   : > { %v3309_v15 = vadd.f32 %v1840_v12, %v1832_v11  ;;  %v2470_v16 = vpop.f32.mrb[10].mxu1 }
 0x2f7   : > { %v3313_v18 = vmul.f32 %v2470_v16, %v2470_v16  ;;  %v3315_v19 = vmul.f32 %v2470_v16, %v2458_v0  ;;  %v1683_v20 = vpop.f32.mrb[11].mxu1 }
 0x2f8   : > { %v3319_v22 = vmul.f32 %v1683_v20, %v1683_v20  ;;  %v3321_v23 = vmul.f32 %v1683_v20, %v1643_v1  ;;  %v1897_v20 = vmul.f32 2.0, %v3303_v9 }
 0x2f9   : > { %v3325_v24 = vadd.f32 %v3313_v18, %v3311_v17 }
 0x2fa   : > { %v3329_v25 = vadd.f32 %v3319_v22, %v3317_v21  ;;  %v2473_v26 = vpop.f32.mrb[12].mxu1 }
 0x2fb   : > { %v3333_v28 = vmul.f32 %v2473_v26, %v2473_v26  ;;  %v3335_v29 = vmul.f32 %v2473_v26, %v2461_v2  ;;  %v1693_v30 = vpop.f32.mrb[13].mxu1 }
 0x2fc   : > { %v3339_v32 = vmul.f32 %v1693_v30, %v1693_v30  ;;  %v3341_v33 = vmul.f32 %v1693_v30, %v1653_v3 }
 0x2fd   : > { %v3345_v34 = vadd.f32 %v3333_v28, %v3331_v27 }
 0x2fe   : > { %v3349_v35 = vadd.f32 %v3339_v32, %v3337_v31  ;;  %v2476_v36 = vpop.f32.mrb[14].mxu1 }
 0x2ff   : > { %v3353_v38 = vmul.f32 %v2476_v36, %v2476_v36  ;;  %v3355_v39 = vmul.f32 %v2476_v36, %v2464_v4  ;;  %v1703_v40 = vpop.f32.mrb[15].mxu1  ;;  %v3377_v4 = vstv %s372_s29 }
 0x300   : > { %v3359_v42 = vmul.f32 %v1703_v40, %v1703_v40  ;;  %v3361_v43 = vmul.f32 %v1703_v40, %v1663_v5 }
 0x301   : > { %v3365_v44 = vadd.f32 %v3353_v38, %v3351_v37 }
 0x302   : > { %v3369_v45 = vadd.f32 %v3359_v42, %v3357_v41  ;;  %v2479_v46 = vpop.f32.mrb[16].mxu1 }
 0x303   : > { %v1857_v47 = vsub.f32 %v2479_v46, %v1833_v7  ;;  %v1713_v48 = vpop.f32.mrb[17].mxu1 }
 0x304   : > { %v1856_v49 = vsub.f32 %v1713_v48, %v1832_v11 }
 0x305   : > { %v1865_v2 = vmax.f32 %v1857_v47, 0.0 }
 0x306   : > { %v2482_v50 = vpop.f32.mrb[18].mxu1  ;;  %v1864_v5 = vmax.f32 %v1856_v49, 0.0 }
 0x307   : > { %v1859_v51 = vsub.f32 %v2482_v50, %v3311_v17  ;;  %v1723_v52 = vpop.f32.mrb[19].mxu1 }
 0x308   : > { %v1858_v53 = vsub.f32 %v1723_v52, %v3317_v21 }
 0x309   : > { %v1867_v26 = vmax.f32 %v1859_v51, 0.0 }
 0x30a   : > { %v2485_v54 = vpop.f32.mrb[20].mxu1  ;;  %v1866_v36 = vmax.f32 %v1858_v53, 0.0 }
 0x30b   : > { %v1861_v55 = vsub.f32 %v2485_v54, %v3331_v27  ;;  %v1733_v56 = vpop.f32.mrb[21].mxu1 }
 0x30c   : > { %v1860_v57 = vsub.f32 %v1733_v56, %v3337_v31  ;;  %v1946_v31 = vadd.f32 %v3309_v15, %v3377_v4  ;;  %v1949_v15 = vadd.f32 %v3325_v24, %v3377_v4  ;;  %v1948_v56 = vadd.f32 %v3329_v25, %v3377_v4 }
 0x30d   : > { %v1869_v52 = vmax.f32 %v1861_v55, 0.0 }
 0x30e   : > { %v2488_v58 = vpop.f32.mrb[22].mxu1 }
 0x30f   : > { %v1863_v59 = vsub.f32 %v2488_v58, %v3351_v37  ;;  %v1743_v60 = vpop.f32.mrb[23].mxu1  ;;  %v1868_v58 = vmax.f32 %v1860_v57, 0.0 }
 0x310   : > { %v1862_v61 = vsub.f32 %v1743_v60, %v3357_v41  ;;  %v1896_v41 = vmul.f32 2.0, %v3305_v13 }
 0x312   : > { %v2491_v62 = vpop.f32.mrb[24].mxu1 }
 0x313   : > { %v1873_v63 = vsub.f32 %v2491_v62, %v1841_v8  ;;  %v1753_v0 = vpop.f32.mrb[25].mxu1 }
 0x314   : > { %v1872_v1 = vsub.f32 %v1753_v0, %v1840_v12  ;;  %v1947_v12 = vadd.f32 %v3307_v14, %v3377_v4  ;;  %v1906_v14 = vadd.f32 %v3377_v4, %v1897_v20 }
 0x315   : > { %v1881_v3 = vmax.f32 %v1873_v63, 0.0  ;;  %v1951_v63 = vadd.f32 %v3345_v34, %v3377_v4 }
 0x316   : > { %v1880_v7 = vmax.f32 %v1872_v1, 0.0  ;;  %v2494_v10 = vpop.f32.mrb[26].mxu1 }
 0x317   : > { %v1955_v11 = vadd.f32 %v1881_v3, %v1865_v2  ;;  %v1875_v16 = vsub.f32 %v2494_v10, %v3313_v18  ;;  %v1763_v17 = vpop.f32.mrb[27].mxu1  ;;  %v1870_v10 = vmax.f32 %v1862_v61, 0.0 }
 0x318   : > { %v1954_v21 = vadd.f32 %v1880_v7, %v1864_v5  ;;  %v1874_v8 = vsub.f32 %v1763_v17, %v3319_v22  ;;  %v1871_v5 = vmax.f32 %v1863_v59, 0.0  ;;  %v1950_v7 = vadd.f32 %v3349_v35, %v3377_v4 }
 0x319   : > { %v1963_v27 = vadd.f32 %v1955_v11, %v3379_v6  ;;  %v1883_v30 = vmax.f32 %v1875_v16, 0.0  ;;  %v1953_v35 = vadd.f32 %v3365_v44, %v3377_v4 }
 0x31a   : > { %v1962_v37 = vadd.f32 %v1954_v21, %v3379_v6  ;;  %v1882_v18 = vmax.f32 %v1874_v8, 0.0  ;;  %v2497_v40 = vpop.f32.mrb[28].mxu1 }
 0x31b   : > { %v1971_v46 = vmul.f32 %v1963_v27, %v1947_v12  ;;  %v1957_v47 = vadd.f32 %v1883_v30, %v1867_v26  ;;  %v1877_v22 = vsub.f32 %v2497_v40, %v3333_v28  ;;  %v1773_v48 = vpop.f32.mrb[29].mxu1  ;;  %v1899_v27 = vmul.f32 2.0, %v3315_v19 }
 0x31c   : > { %v1970_v49 = vmul.f32 %v1962_v37, %v1946_v31  ;;  %v1956_v50 = vadd.f32 %v1882_v18, %v1866_v36  ;;  %v1876_v51 = vsub.f32 %v1773_v48, %v3339_v32  ;;  %v1952_v30 = vadd.f32 %v3369_v45, %v3377_v4 }
 0x31d   : > { %v1965_v53 = vadd.f32 %v1957_v47, %v3379_v6  ;;  %v1885_v54 = vmax.f32 %v1877_v22, 0.0  ;;  %2624 = vrcp.f32 %v1971_v46  ;;  %v1898_v37 = vmul.f32 2.0, %v3321_v23 }
 0x31e   : > { %v1964_v28 = vadd.f32 %v1956_v50, %v3379_v6  ;;  %v1884_v60 = vmax.f32 %v1876_v51, 0.0  ;;  %v2500_v62 = vpop.f32.mrb[30].mxu1  ;;  %2626 = vrcp.f32 %v1970_v49  ;;  %v1901_v45 = vmul.f32 2.0, %v3335_v29 }
 0x31f   : > { %v1973_v0 = vmul.f32 %v1965_v53, %v1949_v15  ;;  %v1959_v32 = vadd.f32 %v1885_v54, %v1869_v52  ;;  %v1879_v1 = vsub.f32 %v2500_v62, %v3353_v38  ;;  %v1783_v24 = vpop.f32.mrb[31].mxu1  ;;  %v1905_v38 = vadd.f32 %v3377_v4, %v1896_v41 }
 0x320   : > { %v1972_v55 = vmul.f32 %v1964_v28, %v1948_v56  ;;  %v1958_v2 = vadd.f32 %v1884_v60, %v1868_v58  ;;  %v1878_v3 = vsub.f32 %v1783_v24, %v3359_v42  ;;  %v1908_v50 = vadd.f32 %v3377_v4, %v1899_v27 }
 0x321   : > { %v1967_v25 = vadd.f32 %v1959_v32, %v3379_v6  ;;  %v1887_v57 = vmax.f32 %v1879_v1, 0.0  ;;  %2628 = vrcp.f32 %v1973_v0  ;;  %v1900_v51 = vmul.f32 2.0, %v3341_v33 }
 0x322   : > { %v1966_v34 = vadd.f32 %v1958_v2, %v3379_v6  ;;  %v1886_v11 = vmax.f32 %v1878_v3, 0.0  ;;  %v2503_v16 = vpop.f32.mrb[32].mxu1  ;;  %2630 = vrcp.f32 %v1972_v55  ;;  %v1907_v54 = vadd.f32 %v3377_v4, %v1898_v37 }
 0x323   : > { %v1975_v17 = vmul.f32 %v1967_v25, %v1951_v63  ;;  %v1961_v20 = vadd.f32 %v1887_v57, %v1871_v5  ;;  %v1889_v21 = vsub.f32 %v2503_v16, %v3303_v9  ;;  %v1793_v42 = vpop.f32.mrb[33].mxu1  ;;  %v1910_v63 = vadd.f32 %v3377_v4, %v1901_v45 }
 0x324   : > { %v1974_v59 = vmul.f32 %v1966_v34, %v1950_v7  ;;  %v1960_v8 = vadd.f32 %v1886_v11, %v1870_v10  ;;  %v1888_v12 = vsub.f32 %v1793_v42, %v3305_v13  ;;  %v1909_v24 = vadd.f32 %v3377_v4, %v1900_v51 }
 0x325   : > { %v1969_v61 = vadd.f32 %v1961_v20, %v3379_v6  ;;  %v1914_v26 = vmul.f32 2.0, %v1889_v21  ;;  %2632 = vrcp.f32 %v1975_v17  ;;  %v1903_v25 = vmul.f32 2.0, %v3355_v39 }
 0x326   : > { %v1968_v9 = vadd.f32 %v1960_v8, %v3379_v6  ;;  %v1913_v31 = vmul.f32 2.0, %v1888_v12  ;;  %v2506_v36 = vpop.f32.mrb[34].mxu1  ;;  %2634 = vrcp.f32 %v1974_v59  ;;  %v1902_v34 = vmul.f32 2.0, %v3361_v43 }
 0x327   : > { %v1977_v18 = vmul.f32 %v1969_v61, %v1953_v35  ;;  %v1923_v13 = vadd.f32 %v3379_v6, %v1914_v26  ;;  %v1891_v44 = vsub.f32 %v2506_v36, %v3315_v19  ;;  %v1803_v40 = vpop.f32.mrb[35].mxu1  ;;  %v2625_v49 = vpop.eup %2624  ;;  %v1912_v35 = vadd.f32 %v3377_v4, %v1903_v25 }
 0x328   : > { %v1976_v41 = vmul.f32 %v1968_v9, %v1952_v30  ;;  %v1922_v46 = vadd.f32 %v3379_v6, %v1913_v31  ;;  %v1890_v47 = vsub.f32 %v1803_v40, %v3321_v23  ;;  %v2627_v53 = vpop.eup %2626  ;;  %v1911_v26 = vadd.f32 %v3377_v4, %v1902_v34 }
 0x329   : > { %v1931_v22 = vmul.f32 %v1923_v13, %v1906_v14  ;;  %v1916_v48 = vmul.f32 2.0, %v1891_v44  ;;  %2636 = vrcp.f32 %v1977_v18 }
 0x32a   : > { %v1915_v15 = vmul.f32 2.0, %v1890_v47  ;;  %v2509_v52 = vpop.f32.mrb[36].mxu1  ;;  %v1930_v19 = vmul.f32 %v1922_v46, %v1905_v38  ;;  %2638 = vrcp.f32 %v1976_v41 }
 0x32b   : > { %v1925_v56 = vadd.f32 %v3379_v6, %v1916_v48  ;;  %v1893_v23 = vsub.f32 %v2509_v52, %v3335_v29  ;;  %v1813_v58 = vpop.f32.mrb[37].mxu1  ;;  %v1981_v28 = vmul.f32 %v2625_v49, %v1931_v22  ;;  %v2629_v1 = vpop.eup %2628 }
 0x32c   : > { %v1924_v14 = vadd.f32 %v3379_v6, %v1915_v15  ;;  %v1892_v60 = vsub.f32 %v1813_v58, %v3341_v33  ;;  %v1979_v62 = vmul.f32 %v2627_v53, %v1930_v19  ;;  %v2631_v5 = vpop.eup %2630 }
 0x32d   : > { %v1933_v0 = vmul.f32 %v1925_v56, %v1908_v50  ;;  %v1918_v32 = vmul.f32 2.0, %v1893_v23  ;;  %v1995_v8 = vsub.f32 1.0, %v1981_v28 }
 0x32e   : > { %v1932_v55 = vmul.f32 %v1924_v14, %v1907_v54  ;;  %v1917_v2 = vmul.f32 2.0, %v1892_v60  ;;  %v2512_v3 = vpop.f32.mrb[38].mxu1  ;;  %v1994_v29 = vsub.f32 1.0, %v1979_v62 }
 0x32f   : > { %v1927_v57 = vadd.f32 %v3379_v6, %v1918_v32  ;;  %v1895_v33 = vsub.f32 %v2512_v3, %v3355_v39  ;;  %v1823_v7 = vpop.f32.mrb[39].mxu1  ;;  %v1985_v10 = vmul.f32 %v2629_v1, %v1933_v0  ;;  %v2633_v21 = vpop.eup %2632 }
 0x330   : > { %v1926_v11 = vadd.f32 %v3379_v6, %v1917_v2  ;;  %v1894_v16 = vsub.f32 %v1823_v7, %v3361_v43  ;;  %2002 = vxpose.xlu0.b32.start [1/8] (short) (narrow) %v1994_v29, 16  ;;  %v1983_v38 = vmul.f32 %v2631_v5, %v1932_v55  ;;  %v2635_v12 = vpop.eup %2634 }
 0x331   : > { %v1935_v17 = vmul.f32 %v1927_v57, %v1910_v63  ;;  %v1920_v20 = vmul.f32 2.0, %v1895_v33  ;;  %v1997_v44 = vsub.f32 1.0, %v1985_v10 }
 0x332   : > { %v1934_v42 = vmul.f32 %v1926_v11, %v1909_v24  ;;  %v1919_v59 = vmul.f32 2.0, %v1894_v16  ;;  %v1996_v36 = vsub.f32 1.0, %v1983_v38 }
 0x333   : > { %v1929_v39 = vadd.f32 %v3379_v6, %v1920_v20  ;;  %v1989_v61 = vmul.f32 %v2633_v21, %v1935_v17  ;;  %v2637_v9 = vpop.eup %2636 }
 0x334   : > { %v1928_v27 = vadd.f32 %v3379_v6, %v1919_v59  ;;  %2003 = vxpose.xlu0.b32.cont [2/8] (short) (narrow) %v1995_v8, 16  ;;  %v1987_v43 = vmul.f32 %v2635_v12, %v1934_v42  ;;  %v2639_v37 = vpop.eup %2638 }
 0x335   : > { %v1937_v30 = vmul.f32 %v1929_v39, %v1912_v35  ;;  %v1999_v41 = vsub.f32 1.0, %v1989_v61 }
 0x336   : > { %v1936_v31 = vmul.f32 %v1928_v27, %v1911_v26  ;;  %v1998_v40 = vsub.f32 1.0, %v1987_v43 }
 0x337   : > { %v1993_v18 = vmul.f32 %v2637_v9, %v1937_v30 }
 0x338   : > { %2004 = vxpose.xlu0.b32.cont [3/8] (short) (narrow) %v1996_v36, 16  ;;  %v1991_v13 = vmul.f32 %v2639_v37, %v1936_v31 }
 0x339   : > { %v2001_v6 = vsub.f32 1.0, %v1993_v18 }
 0x33a   : > { %v2000_v4 = vsub.f32 1.0, %v1991_v13 }
 0x33c   : > { %2005 = vxpose.xlu0.b32.cont [4/8] (short) (narrow) %v1997_v44, 16 }
 0x340   : > { %2006 = vxpose.xlu0.b32.cont [5/8] (short) (narrow) %v1998_v40, 16 }
 0x344   : > { %2007 = vxpose.xlu0.b32.cont [6/8] (short) (narrow) %v1999_v41, 16 }
 0x348   : > { %2008 = vxpose.xlu0.b32.cont [7/8] (short) (narrow) %v2000_v4, 16 }
 0x34c   : > { %2009 = vxpose.xlu0.b32.end [8/8] (short) (narrow) %v2001_v6, 16 }
 0x3b0   : > { %v2018_v46 = vpop.trf.xlu0 }
 0x3b1   : > { %2035 = vst.msk [vmem:[%s370_s23] sm:$0xff] %vm2034_vm1, %v2018_v46 }
 0x3b4   : > { %v2019_v47 = vpop.trf.xlu0 }
 0x3b5   : > { %2036 = vst.msk [vmem:[%s370_s23 + $0x8] sm:$0xff] %vm2034_vm1, %v2019_v47 }
 0x3b6   : > { %2784 = shalt.err (!%p2781_p9)
}
 0x3b7   : > { %s2785_s19 = scalar_lea.hbm %s3450_s20, 256  ;;  %s2789_s29 = scalar_lea.hbm %s3557_s6, 512 }
 0x3b8   : > { %p2786_p2 = scmp.ne.s32.totalorder %s3450_s20, %s2785_s19  ;;  %p2790_p5 = scmp.lt.u32.totalorder %s3450_s20, %s3557_s6 }
 0x3b9   : > { %p2791_p11 = scmp.lt.u32.totalorder %s2789_s29, %s2785_s19  ;;  %p2793_p7 = scmp.lt.u32.totalorder %s2785_s19, %s3450_s20 }
 0x3ba   : > { %p2787_p1 = pnand %p2786_p2, %p3558_p4 }
 0x3bb   : > { %p2792_p3 = por %p2791_p11, %p2790_p5 }
 0x3bc   : > { %p2788_p10 = pneg %p2787_p1 }
 0x3bd   : > { %p2794_p8 = por %p2793_p7, %p2792_p3 }
 0x3bf   : > { %p2795_p0 = pnand %p2794_p8, %p2788_p10 }
 0x3c1   : > { %2798 = shalt.err (!%p2795_p0)
}
 0x3c2   : > { %s2875_s18 = smov 128   ;;  %s2876_s23 = smov 8  }
 0x3c3   : > { %2537 = dma.vmem_to_hbm [thread:$0]  (%p3558_p4), %s3445_s21, 256, %s3450_s20, %s2038_s11, %s2875_s18, %s2875_s18, %s2876_s23  }
 0x3c4 PF: > { %s3559_s7 = sld [smem:[#allocation18_spill]]  ;;  %s3560_s30 = sld [smem:[#allocation21_spill]] }
 0x3c5   : > { %p3562_p12 = scmp.ge.s32.totalorder %s2865_s28, 2 }
 0x3ca   : > { %s2068_s17 = sand.u32 1, %s3559_s7   ;;  %p3561_p13 = scmp.ne.s32.totalorder %s3560_s30, 0 }
 0x3cb   : > { %s2069_s22 = scalar_lea.sflag [#allocation5], %s2068_s17 }
 0x3cc   : > { %p2557_p6 = pnand %p3562_p12, %p3561_p13 }
 0x3ce   : > { %2840 = dma.done.wait (!%p2557_p6), %s2069_s22, 256  }
 0x3cf   : > { %2842 = vsyncadd (!%p2557_p6), %s2069_s22, 4294967040  ;;  %s23_s28 = sadd.s32 1, %s2865_s28   ;;  %s3563_s23 = smov %s2849_s24 }
 0x3d0   : > { %p20_p9 = scmp.ge.s32.totalorder %s23_s28, 4   ;;  %s3564_s24 = smov %s2853_s25 }
 0x3d1   : > { %s3565_s25 = smov %s3051_s26  ;;  %s3566_s26 = smov %s2861_s27 }
 0x3d2   : > { %s3567_s27 = smov %s3569_s16  ;;  %22 = sbr.rel (!%p20_p9) target bundleno = 11 (0xb), region = 115 }
 0x3d9   :  { %2074 = vsyncpa [#allocation4], 1 }
 0x3da   :  { %2076 = vsyncpa [#allocation4 + $0x1], 1 }
 0x3db   :  { %2077 = vsyncpa [#allocation9], 1 }
 0x3dc   :  { %2078 = vsyncpa [#allocation5], 1 }
 0x3dd   :  { %2080 = vsyncpa [#allocation5 + $0x1], 1 }
 0x3de   :  { %2081 = vsyncpa [#allocation6], 1 }
 0x3df   :  { %2083 = vsyncpa [#allocation6 + $0x1], 1 }

</bundles_post_ra>
